<compile_context>
chip_gen: v7x
topology: tpu7x:2x2x1
jax: 0.10.0
libtpu: 0.0.40
codegen_flags: <defaults>
</compile_context>

<pallas_src>
import functools

import jax
import jax.numpy as jnp
import numpy as np
from jax.experimental import pallas as pl
from jax.experimental.pallas import tpu as pltpu

DIM_X = 3
NE = 32
HIDDEN = 1024


def _round_up(n, m):
    return ((n + m - 1) // m) * m


def transition_kernel(x_ref, w1t_ref, b1_ref, w2t_ref, b2_ref, wmf_ref, o_ref):
    x = x_ref[...]                                    # (TB, dim_x)
    w1t = w1t_ref[...]                                # (dim_x, 1024)

    # Stage 1: Linear(dim_x -> 1024) + ReLU.  K=3 is MXU-hostile, so do it on the
    # VPU as dim_x broadcast-FMAs.
    h = (b1_ref[...]
         + x[:, 0:1] * w1t[0:1, :]
         + x[:, 1:2] * w1t[1:2, :]
         + x[:, 2:3] * w1t[2:3, :])                   # (TB, 1024)
    h = jnp.maximum(h, 0.0)

    # Stage 2: Linear(1024 -> ne) on the MXU + numerically-stable softmax.
    logits = jnp.dot(h, w2t_ref[...], preferred_element_type=jnp.float32) + b2_ref[...]
    m = jnp.max(logits, axis=-1, keepdims=True)
    e = jnp.exp(logits - m)
    a = e * pl.reciprocal(jnp.sum(e, axis=-1, keepdims=True), approx=True)   # (TB, ne)

    # Stage 3: x + matrix(outer(x, a).reshape(B, dim_x*ne)).
    # Exact rewrite: out[b,k] = x[b,k] + sum_i x[b,i] * (a @ Wm[:, i*ne:(i+1)*ne]^T)[b,k]
    # fused into ONE (TB, ne) @ (ne, dim_x*dim_x) matmul + dim_x broadcast-FMAs.
    y = jnp.dot(a, wmf_ref[...], preferred_element_type=jnp.float32)         # (TB, dim_x*dim_x)
    out = x
    for i in range(DIM_X):                            # dim_x is tiny & static
        out = out + x[:, i:i + 1] * y[:, DIM_X * i:DIM_X * (i + 1)]
    o_ref[...] = out


def prepare_transition_params(w1, b1, w2, b2, wm):
    """One-time preprocessing (do NOT pay this per forward call).

    w1: (1024, dim_x); b1: (1024,); w2: (ne, 1024); b2: (ne,); wm: (dim_x, ne*dim_x)
    """
    w1t = jnp.asarray(w1, jnp.float32).T                              # (dim_x, 1024)
    b1r = jnp.asarray(b1, jnp.float32).reshape(1, HIDDEN)             # (1, 1024)
    w2t = jnp.asarray(w2, jnp.float32).T                              # (1024, ne)
    b2r = jnp.asarray(b2, jnp.float32).reshape(1, NE)                 # (1, ne)
    # wm_fused[j, i*dim_x + k] = Wm[k, i*ne + j]  -> y = a @ wm_fused gives, per
    # column-group i, exactly (a @ Wm[:, i*ne:(i+1)*ne]^T).
    wm3 = jnp.asarray(wm, jnp.float32).reshape(DIM_X, DIM_X, NE)
    wm_fused = jnp.transpose(wm3, (2, 1, 0)).reshape(NE, DIM_X * DIM_X)
    return (w1t, b1r, w2t, b2r, wm_fused)


@functools.partial(jax.jit, static_argnames=("tb",))
def transition_model_forward(x, params, *, tb=512):
    """x: (B, dim_x) float; params from prepare_transition_params. Returns (B, dim_x)."""
    x = jnp.asarray(x, jnp.float32)
    B = x.shape[0]
    # Batch tile: multiple of 8 (sublane rule), sized conservatively so the
    # (TB, 1024) f32 intermediate stays well under v5e's 16 MiB / v7x's scoped VMEM.
    tb = min(tb, _round_up(B, 8))
    b_pad = _round_up(B, tb)
    if b_pad != B:
        x = jnp.pad(x, ((0, b_pad - B), (0, 0)))      # tail tile padded (then sliced off)

    w1t, b1r, w2t, b2r, wmf = params
    flops = 2 * b_pad * (DIM_X * HIDDEN + HIDDEN * NE + NE * DIM_X * DIM_X)
    bytes_accessed = 4 * (2 * b_pad * DIM_X
                          + w1t.size + b1r.size + w2t.size + b2r.size + wmf.size)

    out = pl.pallas_call(
        transition_kernel,
        out_shape=jax.ShapeDtypeStruct((b_pad, DIM_X), jnp.float32),
        grid=(b_pad // tb,),
        in_specs=[
            pl.BlockSpec((tb, DIM_X), lambda i: (i, 0)),            # x: tiled over batch
            pl.BlockSpec((DIM_X, HIDDEN), lambda i: (0, 0)),        # weights: VMEM-resident
            pl.BlockSpec((1, HIDDEN), lambda i: (0, 0)),
            pl.BlockSpec((HIDDEN, NE), lambda i: (0, 0)),
            pl.BlockSpec((1, NE), lambda i: (0, 0)),
            pl.BlockSpec((NE, DIM_X * DIM_X), lambda i: (0, 0)),
        ],
        out_specs=pl.BlockSpec((tb, DIM_X), lambda i: (i, 0)),
        compiler_params=pltpu.CompilerParams(
            dimension_semantics=("parallel",),        # megacore sharding on v7x; no-op on v5e/v6e
        ),
        cost_estimate=pl.CostEstimate(
            flops=flops,
            transcendentals=b_pad * (NE + 1),
            bytes_accessed=bytes_accessed,
        ),
    )(x, w1t, b1r, w2t, b2r, wmf)
    return out[:B]


def reference_forward(x, w1, b1, w2, b2, wm):
    h = jnp.maximum(x @ w1.T + b1, 0.0)
    a = jax.nn.softmax(h @ w2.T + b2, axis=1)
    outer = x[:, :, None] * a[:, None, :]             # (B, dim_x, ne)
    cat = outer.reshape(x.shape[0], DIM_X * NE)
    return x + cat @ wm.T


if __name__ == "__main__":
    key = jax.random.PRNGKey(0)
    kx, k1, kb1, k2, kb2, km = jax.random.split(key, 6)

    B = 8
    x = jax.random.normal(kx, (B, DIM_X), dtype=jnp.float32)

    # Deterministic synthetic parameters (shapes match the nn.Linear defs).
    w1 = jax.random.normal(k1, (HIDDEN, DIM_X), dtype=jnp.float32) * 0.1
    b1 = jax.random.normal(kb1, (HIDDEN,), dtype=jnp.float32) * 0.1
    w2 = jax.random.normal(k2, (NE, HIDDEN), dtype=jnp.float32) * 0.02
    b2 = jax.random.normal(kb2, (NE,), dtype=jnp.float32) * 0.1
    wm = jax.random.normal(km, (DIM_X, DIM_X * NE), dtype=jnp.float32) * 0.1

    params = prepare_transition_params(w1, b1, w2, b2, wm)   # hoisted, one-time
    out = transition_model_forward(x, params)
    out = jax.block_until_ready(out)

    ref = reference_forward(x, w1, b1, w2, b2, wm)
    # Slightly loose tolerance: softmax denominator uses the EUP approx reciprocal.
    np.testing.assert_allclose(np.asarray(out), np.asarray(ref), rtol=2e-3, atol=2e-3)

    print("KERNEL_OK")
</pallas_src>

<mosaic_0001>
module attributes {stable_mosaic.version = 11 : i64} {
  func.func @transition_kernel(%arg0: i32, %arg1: memref<8x3xf32, #tpu.memory_space<vmem>>, %arg2: memref<3x1024xf32, #tpu.memory_space<vmem>>, %arg3: memref<1x1024xf32, #tpu.memory_space<vmem>>, %arg4: memref<1024x32xf32, #tpu.memory_space<vmem>>, %arg5: memref<1x32xf32, #tpu.memory_space<vmem>>, %arg6: memref<32x9xf32, #tpu.memory_space<vmem>>, %arg7: memref<8x3xf32, #tpu.memory_space<vmem>>) attributes {dimension_semantics = [#tpu.dimension_semantics<parallel>], iteration_bounds = array<i64: 1>, scalar_prefetch = 0 : i64, scratch_operands = 0 : i64, tpu.core_type = #tpu.core_type<tc>, window_params = [{transform_indices = @transform_0, window_bounds = array<i64: 8, 3>}, {pipeline_mode = #tpu.pipeline_mode<synchronous>, transform_indices = @transform_1, window_bounds = array<i64: 3, 1024>}, {pipeline_mode = #tpu.pipeline_mode<synchronous>, transform_indices = @transform_2, window_bounds = array<i64: 1, 1024>}, {pipeline_mode = #tpu.pipeline_mode<synchronous>, transform_indices = @transform_3, window_bounds = array<i64: 1024, 32>}, {pipeline_mode = #tpu.pipeline_mode<synchronous>, transform_indices = @transform_4, window_bounds = array<i64: 1, 32>}, {pipeline_mode = #tpu.pipeline_mode<synchronous>, transform_indices = @transform_5, window_bounds = array<i64: 32, 9>}, {transform_indices = @transform_6, window_bounds = array<i64: 8, 3>}]} {
    %c0 = arith.constant 0 : index
    %c0_0 = arith.constant 0 : index
    %0 = vector.load %arg1[%c0, %c0_0] : memref<8x3xf32, #tpu.memory_space<vmem>>, vector<8x3xf32>
    %c0_1 = arith.constant 0 : index
    %c0_2 = arith.constant 0 : index
    %1 = vector.load %arg2[%c0_1, %c0_2] : memref<3x1024xf32, #tpu.memory_space<vmem>>, vector<3x1024xf32>
    %c0_3 = arith.constant 0 : index
    %c0_4 = arith.constant 0 : index
    %2 = vector.load %arg3[%c0_3, %c0_4] : memref<1x1024xf32, #tpu.memory_space<vmem>>, vector<1x1024xf32>
    %3 = vector.extract_strided_slice %0 {offsets = [0, 0], sizes = [8, 1], strides = [1, 1]} : vector<8x3xf32> to vector<8x1xf32>
    %4 = vector.extract_strided_slice %1 {offsets = [0, 0], sizes = [1, 1024], strides = [1, 1]} : vector<3x1024xf32> to vector<1x1024xf32>
    %5 = vector.broadcast %3 : vector<8x1xf32> to vector<8x1024xf32>
    %6 = vector.broadcast %4 : vector<1x1024xf32> to vector<8x1024xf32>
    %7 = arith.mulf %5, %6 : vector<8x1024xf32>
    %8 = vector.broadcast %2 : vector<1x1024xf32> to vector<8x1024xf32>
    %9 = arith.addf %8, %7 : vector<8x1024xf32>
    %10 = vector.extract_strided_slice %0 {offsets = [0, 1], sizes = [8, 1], strides = [1, 1]} : vector<8x3xf32> to vector<8x1xf32>
    %11 = vector.extract_strided_slice %1 {offsets = [1, 0], sizes = [1, 1024], strides = [1, 1]} : vector<3x1024xf32> to vector<1x1024xf32>
    %12 = vector.broadcast %10 : vector<8x1xf32> to vector<8x1024xf32>
    %13 = vector.broadcast %11 : vector<1x1024xf32> to vector<8x1024xf32>
    %14 = arith.mulf %12, %13 : vector<8x1024xf32>
    %15 = arith.addf %9, %14 : vector<8x1024xf32>
    %16 = vector.extract_strided_slice %0 {offsets = [0, 2], sizes = [8, 1], strides = [1, 1]} : vector<8x3xf32> to vector<8x1xf32>
    %17 = vector.extract_strided_slice %1 {offsets = [2, 0], sizes = [1, 1024], strides = [1, 1]} : vector<3x1024xf32> to vector<1x1024xf32>
    %18 = vector.broadcast %16 : vector<8x1xf32> to vector<8x1024xf32>
    %19 = vector.broadcast %17 : vector<1x1024xf32> to vector<8x1024xf32>
    %20 = arith.mulf %18, %19 : vector<8x1024xf32>
    %21 = arith.addf %15, %20 : vector<8x1024xf32>
    %cst = arith.constant 0.000000e+00 : f32
    %22 = vector.broadcast %cst : f32 to vector<8x1024xf32>
    %23 = arith.maximumf %21, %22 : vector<8x1024xf32>
    %c0_5 = arith.constant 0 : index
    %c0_6 = arith.constant 0 : index
    %24 = vector.load %arg4[%c0_5, %c0_6] : memref<1024x32xf32, #tpu.memory_space<vmem>>, vector<1024x32xf32>
    %cst_7 = arith.constant dense<0.000000e+00> : vector<8x32xf32>
    %25 = tpu.matmul %23, %24, %cst_7 {dimension_numbers = #tpu.dot_dimension_numbers<[1], [0], [0], [1], [0, 0, 1, 1], [], []>} : vector<8x1024xf32>, vector<1024x32xf32>, vector<8x32xf32> -> vector<8x32xf32>
    %c0_8 = arith.constant 0 : index
    %c0_9 = arith.constant 0 : index
    %26 = vector.load %arg5[%c0_8, %c0_9] : memref<1x32xf32, #tpu.memory_space<vmem>>, vector<1x32xf32>
    %27 = vector.broadcast %26 : vector<1x32xf32> to vector<8x32xf32>
    %28 = arith.addf %25, %27 : vector<8x32xf32>
    %cst_10 = arith.constant dense<0xFF800000> : vector<8xf32>
    %29 = vector.multi_reduction <maximumf>, %28, %cst_10 [1] : vector<8x32xf32> to vector<8xf32>
    %30 = vector.shape_cast %29 : vector<8xf32> to vector<8x1xf32>
    %31 = vector.broadcast %30 : vector<8x1xf32> to vector<8x32xf32>
    %32 = arith.subf %28, %31 : vector<8x32xf32>
    %33 = math.exp %32 : vector<8x32xf32>
    %cst_11 = arith.constant dense<0.000000e+00> : vector<8xf32>
    %34 = vector.multi_reduction <add>, %33, %cst_11 [1] : vector<8x32xf32> to vector<8xf32>
    %35 = vector.shape_cast %34 : vector<8xf32> to vector<8x1xf32>
    %36 = tpu.reciprocal %35 {approx = true} : vector<8x1xf32> -> vector<8x1xf32>
    %37 = vector.broadcast %36 : vector<8x1xf32> to vector<8x32xf32>
    %38 = arith.mulf %33, %37 : vector<8x32xf32>
    %c0_12 = arith.constant 0 : index
    %c0_13 = arith.constant 0 : index
    %39 = vector.load %arg6[%c0_12, %c0_13] : memref<32x9xf32, #tpu.memory_space<vmem>>, vector<32x9xf32>
    %cst_14 = arith.constant dense<0.000000e+00> : vector<8x9xf32>
    %40 = tpu.matmul %38, %39, %cst_14 {dimension_numbers = #tpu.dot_dimension_numbers<[1], [0], [0], [1], [0, 0, 1, 1], [], []>} : vector<8x32xf32>, vector<32x9xf32>, vector<8x9xf32> -> vector<8x9xf32>
    %41 = vector.extract_strided_slice %0 {offsets = [0, 0], sizes = [8, 1], strides = [1, 1]} : vector<8x3xf32> to vector<8x1xf32>
    %42 = vector.extract_strided_slice %40 {offsets = [0, 0], sizes = [8, 3], strides = [1, 1]} : vector<8x9xf32> to vector<8x3xf32>
    %43 = vector.broadcast %41 : vector<8x1xf32> to vector<8x3xf32>
    %44 = arith.mulf %43, %42 : vector<8x3xf32>
    %45 = arith.addf %0, %44 : vector<8x3xf32>
    %46 = vector.extract_strided_slice %0 {offsets = [0, 1], sizes = [8, 1], strides = [1, 1]} : vector<8x3xf32> to vector<8x1xf32>
    %47 = vector.extract_strided_slice %40 {offsets = [0, 3], sizes = [8, 3], strides = [1, 1]} : vector<8x9xf32> to vector<8x3xf32>
    %48 = vector.broadcast %46 : vector<8x1xf32> to vector<8x3xf32>
    %49 = arith.mulf %48, %47 : vector<8x3xf32>
    %50 = arith.addf %45, %49 : vector<8x3xf32>
    %51 = vector.extract_strided_slice %0 {offsets = [0, 2], sizes = [8, 1], strides = [1, 1]} : vector<8x3xf32> to vector<8x1xf32>
    %52 = vector.extract_strided_slice %40 {offsets = [0, 6], sizes = [8, 3], strides = [1, 1]} : vector<8x9xf32> to vector<8x3xf32>
    %53 = vector.broadcast %51 : vector<8x1xf32> to vector<8x3xf32>
    %54 = arith.mulf %53, %52 : vector<8x3xf32>
    %55 = arith.addf %50, %54 : vector<8x3xf32>
    %c0_15 = arith.constant 0 : index
    %c0_16 = arith.constant 0 : index
    %56 = vector.load %arg7[%c0_15, %c0_16] : memref<8x3xf32, #tpu.memory_space<vmem>>, vector<8x3xf32>
    tpu.vector_store %arg7[%c0_15, %c0_16], %55 {strides = array<i32>} : memref<8x3xf32, #tpu.memory_space<vmem>>, vector<8x3xf32>,
    return
  }
  func.func @transform_0(%arg0: i32) -> (i32, i32) {
    %c0_i32 = arith.constant 0 : i32
    %c0_i32_0 = arith.constant 0 : i32
    return %arg0, %c0_i32 : i32, i32
  }
  func.func @transform_1(%arg0: i32) -> (i32, i32) {
    %c0_i32 = arith.constant 0 : i32
    %c0_i32_0 = arith.constant 0 : i32
    %c0_i32_1 = arith.constant 0 : i32
    return %c0_i32, %c0_i32_0 : i32, i32
  }
  func.func @transform_2(%arg0: i32) -> (i32, i32) {
    %c0_i32 = arith.constant 0 : i32
    %c0_i32_0 = arith.constant 0 : i32
    %c0_i32_1 = arith.constant 0 : i32
    return %c0_i32, %c0_i32_0 : i32, i32
  }
  func.func @transform_3(%arg0: i32) -> (i32, i32) {
    %c0_i32 = arith.constant 0 : i32
    %c0_i32_0 = arith.constant 0 : i32
    %c0_i32_1 = arith.constant 0 : i32
    return %c0_i32, %c0_i32_0 : i32, i32
  }
  func.func @transform_4(%arg0: i32) -> (i32, i32) {
    %c0_i32 = arith.constant 0 : i32
    %c0_i32_0 = arith.constant 0 : i32
    %c0_i32_1 = arith.constant 0 : i32
    return %c0_i32, %c0_i32_0 : i32, i32
  }
  func.func @transform_5(%arg0: i32) -> (i32, i32) {
    %c0_i32 = arith.constant 0 : i32
    %c0_i32_0 = arith.constant 0 : i32
    %c0_i32_1 = arith.constant 0 : i32
    return %c0_i32, %c0_i32_0 : i32, i32
  }
  func.func @transform_6(%arg0: i32) -> (i32, i32) {
    %c0_i32 = arith.constant 0 : i32
    %c0_i32_0 = arith.constant 0 : i32
    return %arg0, %c0_i32 : i32, i32
  }
}

</mosaic_0001>

<bundles_post_ra>
// kernel: transition_model_forward.1
= control target key start
LH: loop header
LB: loop body
LE: loop exit
PB: predicated region body
PF: predicated region fallthrough
CT: control target
= control target key end

     0   :  { %v1191_v0 = vmov 0   ;;  %v1192_v2 = vmov 2   ;;  %v1193_v22 = vmov 1   ;;  %vm774_vm0 = vcmask 261120   ;;  %s1197_s12 = smov 122   ;;  %s1790_s0 = inlined_call_operand.vmem [shape: f32[8,3], index: 0, kind: input, shape index: {}]   ;;  %s1791_s3 = inlined_call_operand.vmem [shape: f32[1024,32], index: 3, kind: input, shape index: {}]   ;;  %s1792_s1 = inlined_call_operand.vmem [shape: f32[3,1024], index: 1, kind: input, shape index: {}]   ;;  %s1793_s2 = inlined_call_operand.vmem [shape: f32[1,1024], index: 2, kind: input, shape index: {}]   ;;  %s1794_s4 = inlined_call_operand.vmem [shape: f32[1,32], index: 4, kind: input, shape index: {}]   ;;  %s1795_s5 = inlined_call_operand.vmem [shape: f32[32,9], index: 5, kind: input, shape index: {}]   ;;  %s1796_s6 = inlined_call_operand.vmem [shape: f32[8,3], index: 6, kind: output, shape index: {}]  }
   0x1   :  { %1183 = vset.pattern.permute.xlu0 %v1191_v0  ;;  %v1237_v1 = vld [vmem:[%s1790_s0] sm:$0xff]  ;;  %1185 = vset.pattern.permute.xlu1 %v1192_v2  ;;  %v376_v4 = vld [vmem:[%s1791_s3 + $0x88] sm:$0xff]  ;;  %v377_v15 = vld [vmem:[%s1791_s3 + $0x90] sm:$0xff]  ;;  %vm1195_vm1 = vmmov 0   ;;  %vm877_vm2 = vcmask 23552  }
   0x2   :  { %v375_v3 = vld [vmem:[%s1791_s3 + $0x80] sm:$0xff]  ;;  %31 = vperm.xlu0 %1183, %v1237_v1   ;;  %260 = vperm.xlu1 %1185, %v1237_v1   ;;  %v408_v7 = vld [vmem:[%s1791_s3 + $0x188] sm:$0xff]  ;;  %v378_v16 = vld [vmem:[%s1791_s3 + $0x98] sm:$0xff] }
   0x3   :  { %v1041_v5 = vpack.c.bf16 %v376_v4, %v375_v3  ;;  %v407_v6 = vld [vmem:[%s1791_s3 + $0x180] sm:$0xff]  ;;  %v360_v10 = vld [vmem:[%s1791_s3 + $0x8] sm:$0xff]  ;;  %v409_v17 = vld [vmem:[%s1791_s3 + $0x190] sm:$0xff]  ;;  %v1045_v18 = vpack.c.bf16 %v378_v16, %v377_v15 }
   0x4   :  { %v359_v8 = vld [vmem:[%s1791_s3] sm:$0xff]  ;;  %v1073_v9 = vpack.c.bf16 %v408_v7, %v407_v6  ;;  %v392_v12 = vld [vmem:[%s1791_s3 + $0x108] sm:$0xff]  ;;  %v410_v19 = vld [vmem:[%s1791_s3 + $0x198] sm:$0xff] }
   0x5   :  { %v391_v11 = vld [vmem:[%s1791_s3 + $0x100] sm:$0xff]  ;;  %1042 = vmatprep.subr.bf16.mxu0 %v1041_v5  ;;  %v1043_v13 = vpack.c.bf16 %v360_v10, %v359_v8  ;;  %v361_v20 = vld [vmem:[%s1791_s3 + $0x10] sm:$0xff]  ;;  %v362_v21 = vld [vmem:[%s1791_s3 + $0x18] sm:$0xff]  ;;  %v1077_v23 = vpack.c.bf16 %v410_v19, %v409_v17 }
   0x6   :  { %v1075_v14 = vpack.c.bf16 %v392_v12, %v391_v11  ;;  %1074 = vmatprep.subr.bf16.mxu1 %v1073_v9  ;;  %1184 = vset.pattern.permute.xlu0 %v1193_v22  ;;  %v1047_v24 = vpack.c.bf16 %v362_v21, %v361_v20  ;;  %v393_v25 = vld [vmem:[%s1791_s3 + $0x110] sm:$0xff]  ;;  %v394_v26 = vld [vmem:[%s1791_s3 + $0x118] sm:$0xff]  ;;  %v379_v27 = vld [vmem:[%s1791_s3 + $0xa0] sm:$0xff] }
   0x7   :  { %1044 = vmatpush3.bf16.msra.mxu0 %v1043_v13  ;;  %168 = vperm.xlu0 %1184, %v1237_v1   ;;  %v1079_v28 = vpack.c.bf16 %v394_v26, %v393_v25  ;;  %v380_v29 = vld [vmem:[%s1791_s3 + $0xa8] sm:$0xff]  ;;  %v411_v30 = vld [vmem:[%s1791_s3 + $0x1a0] sm:$0xff]  ;;  %v381_v38 = vld [vmem:[%s1791_s3 + $0xb0] sm:$0xff] }
   0x8   :  { %1076 = vmatpush3.bf16.msra.mxu1 %v1075_v14  ;;  %v412_v31 = vld [vmem:[%s1791_s3 + $0x1a8] sm:$0xff]  ;;  %1046 = vmatprep.subr.bf16.mxu0 %v1045_v18  ;;  %v1049_v32 = vpack.c.bf16 %v380_v29, %v379_v27  ;;  %v363_v34 = vld [vmem:[%s1791_s3 + $0x20] sm:$0xff]  ;;  %v382_v39 = vld [vmem:[%s1791_s3 + $0xb8] sm:$0xff] }
   0x9   :  { %1078 = vmatprep.subr.bf16.mxu1 %v1077_v23  ;;  %v1081_v33 = vpack.c.bf16 %v412_v31, %v411_v30  ;;  %v364_v35 = vld [vmem:[%s1791_s3 + $0x28] sm:$0xff]  ;;  %v395_v36 = vld [vmem:[%s1791_s3 + $0x120] sm:$0xff]  ;;  %v413_v41 = vld [vmem:[%s1791_s3 + $0x1b0] sm:$0xff]  ;;  %v1053_v44 = vpack.c.bf16 %v382_v39, %v381_v38 }
   0xa   :  { %v396_v37 = vld [vmem:[%s1791_s3 + $0x128] sm:$0xff]  ;;  %v1051_v40 = vpack.c.bf16 %v364_v35, %v363_v34  ;;  %v414_v42 = vld [vmem:[%s1791_s3 + $0x1b8] sm:$0xff]  ;;  %v365_v45 = vld [vmem:[%s1791_s3 + $0x30] sm:$0xff] }
   0xb   :  { %1048 = vmatpush3.bf16.msra.mxu0 %v1047_v24  ;;  %v1083_v43 = vpack.c.bf16 %v396_v37, %v395_v36  ;;  %v366_v46 = vld [vmem:[%s1791_s3 + $0x38] sm:$0xff]  ;;  %v397_v47 = vld [vmem:[%s1791_s3 + $0x130] sm:$0xff]  ;;  %v1085_v48 = vpack.c.bf16 %v414_v42, %v413_v41  ;;  %v383_v50 = vld [vmem:[%s1791_s3 + $0xc0] sm:$0xff]  ;;  %1186 = vset.pattern.permute.xlu0 %v1192_v2 }
   0xc   :  { %1080 = vmatpush3.bf16.msra.mxu1 %v1079_v28  ;;  %1050 = vmatprep.subr.bf16.mxu0 %v1049_v32  ;;  %v398_v49 = vld [vmem:[%s1791_s3 + $0x138] sm:$0xff]  ;;  %v384_v51 = vld [vmem:[%s1791_s3 + $0xc8] sm:$0xff]  ;;  %v415_v52 = vld [vmem:[%s1791_s3 + $0x1c0] sm:$0xff]  ;;  %v1055_v54 = vpack.c.bf16 %v366_v46, %v365_v45 }
   0xd   :  { %1082 = vmatprep.subr.bf16.mxu1 %v1081_v33  ;;  %v416_v53 = vld [vmem:[%s1791_s3 + $0x1c8] sm:$0xff]  ;;  %v1087_v55 = vpack.c.bf16 %v398_v49, %v397_v47  ;;  %v1057_v56 = vpack.c.bf16 %v384_v51, %v383_v50  ;;  %v367_v57 = vld [vmem:[%s1791_s3 + $0x40] sm:$0xff]  ;;  %v385_v62 = vld [vmem:[%s1791_s3 + $0xd0] sm:$0xff] }
   0xe   :  { %v368_v58 = vld [vmem:[%s1791_s3 + $0x48] sm:$0xff]  ;;  %v399_v59 = vld [vmem:[%s1791_s3 + $0x140] sm:$0xff]  ;;  %v1089_v60 = vpack.c.bf16 %v416_v53, %v415_v52  ;;  %v386_v63 = vld [vmem:[%s1791_s3 + $0xd8] sm:$0xff] }
   0xf   :  { %1052 = vmatpush3.bf16.msra.mxu0 %v1051_v40  ;;  %v400_v61 = vld [vmem:[%s1791_s3 + $0x148] sm:$0xff]  ;;  %v417_v0 = vld [vmem:[%s1791_s3 + $0x1d0] sm:$0xff]  ;;  %v418_v2 = vld [vmem:[%s1791_s3 + $0x1d8] sm:$0xff]  ;;  %v1059_v3 = vpack.c.bf16 %v368_v58, %v367_v57  ;;  %v1061_v5 = vpack.c.bf16 %v386_v63, %v385_v62 }
  0x10   :  { %1084 = vmatpush3.bf16.msra.mxu1 %v1083_v43  ;;  %1054 = vmatprep.subr.bf16.mxu0 %v1053_v44  ;;  %v1091_v4 = vpack.c.bf16 %v400_v61, %v399_v59  ;;  %v369_v6 = vld [vmem:[%s1791_s3 + $0x50] sm:$0xff]  ;;  %v370_v7 = vld [vmem:[%s1791_s3 + $0x58] sm:$0xff]  ;;  %v1093_v9 = vpack.c.bf16 %v418_v2, %v417_v0  ;;  %v387_v11 = vld [vmem:[%s1791_s3 + $0xe0] sm:$0xff]  ;;  %v38_v43 = vlaneseq }
  0x11   :  { %1086 = vmatprep.subr.bf16.mxu1 %v1085_v48  ;;  %v401_v8 = vld [vmem:[%s1791_s3 + $0x150] sm:$0xff]  ;;  %v402_v10 = vld [vmem:[%s1791_s3 + $0x158] sm:$0xff]  ;;  %v388_v12 = vld [vmem:[%s1791_s3 + $0xe8] sm:$0xff]  ;;  %v1063_v15 = vpack.c.bf16 %v370_v7, %v369_v6 }
  0x12   :  { %v419_v13 = vld [vmem:[%s1791_s3 + $0x1e0] sm:$0xff]  ;;  %v420_v14 = vld [vmem:[%s1791_s3 + $0x1e8] sm:$0xff]  ;;  %v1095_v16 = vpack.c.bf16 %v402_v10, %v401_v8  ;;  %v1065_v17 = vpack.c.bf16 %v388_v12, %v387_v11  ;;  %v389_v23 = vld [vmem:[%s1791_s3 + $0xf0] sm:$0xff]  ;;  %v39_v44 = vshrl.u32 %v38_v43, 7 }
  0x13   :  { %1056 = vmatpush3.bf16.msra.mxu0 %v1055_v54  ;;  %v371_v18 = vld [vmem:[%s1791_s3 + $0x60] sm:$0xff]  ;;  %v372_v19 = vld [vmem:[%s1791_s3 + $0x68] sm:$0xff]  ;;  %v1097_v21 = vpack.c.bf16 %v420_v14, %v419_v13  ;;  %v390_v24 = vld [vmem:[%s1791_s3 + $0xf8] sm:$0xff] }
  0x14   :  { %1088 = vmatpush3.bf16.msra.mxu1 %v1087_v55  ;;  %1058 = vmatprep.subr.bf16.mxu0 %v1057_v56  ;;  %v403_v20 = vld [vmem:[%s1791_s3 + $0x160] sm:$0xff]  ;;  %v404_v22 = vld [vmem:[%s1791_s3 + $0x168] sm:$0xff]  ;;  %v421_v25 = vld [vmem:[%s1791_s3 + $0x1f0] sm:$0xff]  ;;  %v1067_v27 = vpack.c.bf16 %v372_v19, %v371_v18  ;;  %v1069_v29 = vpack.c.bf16 %v390_v24, %v389_v23  ;;  %v1448_v45 = vsub.s32 4, %v39_v44  ;;  %v1453_v47 = vsub.s32 5, %v39_v44 }
  0x15   :  { %1090 = vmatprep.subr.bf16.mxu1 %v1089_v60  ;;  %v422_v26 = vld [vmem:[%s1791_s3 + $0x1f8] sm:$0xff]  ;;  %v1099_v28 = vpack.c.bf16 %v404_v22, %v403_v20  ;;  %v373_v30 = vld [vmem:[%s1791_s3 + $0x70] sm:$0xff]  ;;  %v439_v35 = vld [vmem:[%s1791_s3 + $0x280] sm:$0xff]  ;;  %v1458_v49 = vsub.s32 6, %v39_v44  ;;  %v1460_v50 = vsub.s32 0, %v39_v44  ;;  %v1463_v52 = vsub.s32 1, %v39_v44 }
  0x16   :  { %v374_v31 = vld [vmem:[%s1791_s3 + $0x78] sm:$0xff]  ;;  %v405_v32 = vld [vmem:[%s1791_s3 + $0x170] sm:$0xff]  ;;  %v1101_v33 = vpack.c.bf16 %v422_v26, %v421_v25  ;;  %v440_v36 = vld [vmem:[%s1791_s3 + $0x288] sm:$0xff]  ;;  %v133_v53 = vsub.s32 3, %v39_v44  ;;  %v1473_v58 = vsub.s32 2, %v39_v44  ;;  %v149_v62 = vsub.s32 7, %v39_v44 }
  0x17   :  { %1060 = vmatpush3.bf16.msra.mxu0 %v1059_v3  ;;  %v406_v34 = vld [vmem:[%s1791_s3 + $0x178] sm:$0xff]  ;;  %v471_v37 = vld [vmem:[%s1791_s3 + $0x380] sm:$0xff]  ;;  %v472_v38 = vld [vmem:[%s1791_s3 + $0x388] sm:$0xff]  ;;  %v1071_v39 = vpack.c.bf16 %v374_v31, %v373_v30  ;;  %v1105_v41 = vpack.c.bf16 %v440_v36, %v439_v35 }
  0x18   :  { %1092 = vmatpush3.bf16.msra.mxu1 %v1091_v4  ;;  %1062 = vmatprep.subr.bf16.mxu0 %v1061_v5  ;;  %v1103_v40 = vpack.c.bf16 %v406_v34, %v405_v32  ;;  %v1137_v42 = vpack.c.bf16 %v472_v38, %v471_v37  ;;  %v24_v46 = vld [vmem:[%s1792_s1] sm:$0x77]  ;;  %v25_v48 = vld [vmem:[%s1792_s1 + $0x8] sm:$0x77]  ;;  %v1480_v61 = vld [vmem:[%s1792_s1 + $0x10] sm:$0x77] }
  0x19   :  { %1094 = vmatprep.subr.bf16.mxu1 %v1093_v9  ;;  %v45_v51 = vrot.slane %v24_v46, %v1448_v45  ;;  %v1468_v54 = vld [vmem:[%s1793_s2] sm:$0xff]  ;;  %v178_v55 = vrot.slane %v24_v46, %v1453_v47  ;;  %v270_v56 = vrot.slane %v24_v46, %v1458_v49  ;;  %v53_v57 = vrot.slane %v25_v48, %v1448_v45  ;;  %v1490_v4 = vld [vmem:[%s1792_s1 + $0x18] sm:$0x77] }
  0x1a   :  { %v186_v59 = vrot.slane %v25_v48, %v1453_v47  ;;  %v278_v60 = vrot.slane %v25_v48, %v1458_v49  ;;  %v126_v0 = vrot.slane %v1468_v54, %v1463_v52  ;;  %v134_v2 = vrot.slane %v1468_v54, %v133_v53 }
  0x1b   :  { %1064 = vmatpush3.bf16.msra.mxu0 %v1063_v15  ;;  %v85_v63 = vrot.slane %v45_v51, %v1460_v50  ;;  %v41_v3 = vrot.slane %v24_v46, %v1460_v50  ;;  %v218_v5 = vrot.slane %v178_v55, %v1463_v52  ;;  %v310_v6 = vrot.slane %v270_v56, %v1473_v58 }
  0x1c   :  { %1096 = vmatpush3.bf16.msra.mxu1 %v1095_v16  ;;  %1066 = vmatprep.subr.bf16.mxu0 %v1065_v17  ;;  %v93_v7 = vrot.slane %v53_v57, %v1460_v50  ;;  %v49_v8 = vrot.slane %v25_v48, %v1460_v50  ;;  %v174_v9 = vrot.slane %v24_v46, %v1463_v52 }
  0x1d   :  { %1098 = vmatprep.subr.bf16.mxu1 %v1097_v21  ;;  %v266_v10 = vrot.slane %v24_v46, %v1473_v58  ;;  %v182_v11 = vrot.slane %v25_v48, %v1463_v52  ;;  %v61_v12 = vrot.slane %v1480_v61, %v1448_v45  ;;  %v226_v13 = vrot.slane %v186_v59, %v1463_v52 }
  0x1e   :  { %v318_v14 = vrot.slane %v278_v60, %v1473_v58  ;;  %v274_v15 = vrot.slane %v25_v48, %v1473_v58  ;;  %v69_v16 = vrot.slane %v1490_v4, %v1448_v45  ;;  %v81_v17 = vrot.slane %v41_v3, %v1460_v50 }
  0x1f   :  { %1068 = vmatpush3.bf16.msra.mxu0 %v1067_v27  ;;  %v122_v18 = vrot.slane %v1468_v54, %v1460_v50  ;;  %v286_v19 = vrot.slane %v1480_v61, %v1458_v49  ;;  %v294_v20 = vrot.slane %v1490_v4, %v1458_v49  ;;  %v89_v21 = vrot.slane %v49_v8, %v1460_v50 }
  0x20   :  { %1100 = vmatpush3.bf16.msra.mxu1 %v1099_v28  ;;  %1070 = vmatprep.subr.bf16.mxu0 %v1069_v29  ;;  %v130_v22 = vrot.slane %v1468_v54, %v1473_v58  ;;  %v194_v23 = vrot.slane %v1480_v61, %v1453_v47  ;;  %v202_v24 = vrot.slane %v1490_v4, %v1453_v47 }
  0x21   :  { %1102 = vmatprep.subr.bf16.mxu1 %v1101_v33  ;;  %v214_v25 = vrot.slane %v174_v9, %v1463_v52  ;;  %v306_v26 = vrot.slane %v266_v10, %v1473_v58  ;;  %v222_v27 = vrot.slane %v182_v11, %v1463_v52  ;;  %v101_v28 = vrot.slane %v61_v12, %v1460_v50 }
  0x22   :  { %v314_v31 = vrot.slane %v274_v15, %v1473_v58  ;;  %v142_v32 = vrot.slane %v1468_v54, %v1453_v47  ;;  %v109_v33 = vrot.slane %v69_v16, %v1460_v50  ;;  %v150_v34 = vrot.slane %v1468_v54, %v149_v62  ;;  %v455_v15 = vld [vmem:[%s1791_s3 + $0x300] sm:$0xff]  ;;  %v456_v16 = vld [vmem:[%s1791_s3 + $0x308] sm:$0xff] }
  0x23   :  { %1072 = vmatpush3.bf16.msra.mxu0 %v1071_v39  ;;  %v326_v37 = vrot.slane %v286_v19, %v1473_v58  ;;  %v334_v38 = vrot.slane %v294_v20, %v1473_v58 }
  0x24   :  { %1104 = vmatpush3.bf16.msra.mxu1 %v1103_v40  ;;  %1106 = vmatprep.subr.bf16.mxu0 %v1105_v41  ;;  %v234_v41 = vrot.slane %v194_v23, %v1463_v52  ;;  %v441_v23 = vld [vmem:[%s1791_s3 + $0x290] sm:$0xff] }
  0x25   :  { %1138 = vmatprep.subr.bf16.mxu1 %v1137_v42  ;;  %v242_v42 = vrot.slane %v202_v24, %v1463_v52 }
  0x81   :  { %v1524_v29 = vpop.permute.xlu0 %31  ;;  %v1526_v30 = vpop.permute.xlu1 %260 }
  0x82   :  { %v111_v35 = vmul.f32 %v85_v63, %v1524_v29  ;;  %v113_v36 = vmul.f32 %v93_v7, %v1524_v29  ;;  %v110_v39 = vmul.f32 %v81_v17, %v1524_v29  ;;  %v112_v40 = vmul.f32 %v89_v21, %v1524_v29 }
  0x83   :  { %v336_v43 = vmul.f32 %v310_v6, %v1526_v30  ;;  %v338_v44 = vmul.f32 %v318_v14, %v1526_v30  ;;  %v335_v46 = vmul.f32 %v306_v26, %v1526_v30  ;;  %v115_v47 = vmul.f32 %v101_v28, %v1524_v29  ;;  %v442_v28 = vld [vmem:[%s1791_s3 + $0x298] sm:$0xff] }
  0x84   :  { %v160_v48 = vadd.f32 %v126_v0, %v111_v35  ;;  %v162_v51 = vadd.f32 %v134_v2, %v113_v36  ;;  %v337_v53 = vmul.f32 %v314_v31, %v1526_v30  ;;  %v117_v55 = vmul.f32 %v109_v33, %v1524_v29  ;;  %v423_v2 = vld [vmem:[%s1791_s3 + $0x200] sm:$0xff]  ;;  %v473_v31 = vld [vmem:[%s1791_s3 + $0x390] sm:$0xff] }
  0x85   :  { %v159_v57 = vadd.f32 %v122_v18, %v110_v39  ;;  %v161_v59 = vadd.f32 %v130_v22, %v112_v40  ;;  %v340_v60 = vmul.f32 %v326_v37, %v1526_v30  ;;  %v342_v62 = vmul.f32 %v334_v38, %v1526_v30  ;;  %v425_v37 = vld [vmem:[%s1791_s3 + $0x210] sm:$0xff]  ;;  %v426_v38 = vld [vmem:[%s1791_s3 + $0x218] sm:$0xff] }
  0x86   :  { %v1547_v56 = vpop.permute.xlu0 %168  ;;  %v164_v7 = vadd.f32 %v142_v32, %v115_v47  ;;  %v166_v9 = vadd.f32 %v150_v34, %v117_v55  ;;  %v474_v32 = vld [vmem:[%s1791_s3 + $0x398] sm:$0xff]  ;;  %v457_v39 = vld [vmem:[%s1791_s3 + $0x310] sm:$0xff]  ;;  %v476_v47 = vld [vmem:[%s1791_s3 + $0x3a8] sm:$0xff] }
  0x87   :  { %v244_v63 = vmul.f32 %v218_v5, %v1547_v56  ;;  %v246_v3 = vmul.f32 %v226_v13, %v1547_v56  ;;  %v243_v6 = vmul.f32 %v214_v25, %v1547_v56  ;;  %v245_v0 = vmul.f32 %v222_v27, %v1547_v56  ;;  %v424_v13 = vld [vmem:[%s1791_s3 + $0x208] sm:$0xff]  ;;  %v458_v40 = vld [vmem:[%s1791_s3 + $0x318] sm:$0xff] }
  0x88   :  { %v248_v8 = vmul.f32 %v234_v41, %v1547_v56  ;;  %v250_v10 = vmul.f32 %v242_v42, %v1547_v56  ;;  %v1107_v24 = vpack.c.bf16 %v424_v13, %v423_v2  ;;  %v1139_v25 = vpack.c.bf16 %v456_v16, %v455_v15  ;;  %v443_v41 = vld [vmem:[%s1791_s3 + $0x2a0] sm:$0xff]  ;;  %v477_v2 = vld [vmem:[%s1791_s3 + $0x3b0] sm:$0xff]  ;;  %v462_v13 = vld [vmem:[%s1791_s3 + $0x338] sm:$0xff] }
  0x89   :  { %v252_v11 = vadd.f32 %v244_v63, %v160_v48  ;;  %v254_v12 = vadd.f32 %v246_v3, %v162_v51  ;;  %v251_v14 = vadd.f32 %v243_v6, %v159_v57  ;;  %v253_v5 = vadd.f32 %v245_v0, %v161_v59  ;;  %v427_v57 = vld [vmem:[%s1791_s3 + $0x220] sm:$0xff]  ;;  %v428_v59 = vld [vmem:[%s1791_s3 + $0x228] sm:$0xff]  ;;  %v445_v6 = vld [vmem:[%s1791_s3 + $0x2b0] sm:$0xff] }
  0x8a   :  { %v256_v17 = vadd.f32 %v248_v8, %v164_v7  ;;  %v258_v18 = vadd.f32 %v250_v10, %v166_v9  ;;  %v1109_v42 = vpack.c.bf16 %v442_v28, %v441_v23  ;;  %v1143_v55 = vpack.c.bf16 %v458_v40, %v457_v39  ;;  %v459_v63 = vld [vmem:[%s1791_s3 + $0x320] sm:$0xff]  ;;  %v460_v3 = vld [vmem:[%s1791_s3 + $0x328] sm:$0xff]  ;;  %v446_v0 = vld [vmem:[%s1791_s3 + $0x2b8] sm:$0xff] }
  0x8b   :  { %v344_v19 = vadd.f32 %v336_v43, %v252_v11  ;;  %v346_v20 = vadd.f32 %v338_v44, %v254_v12  ;;  %v343_v21 = vadd.f32 %v335_v46, %v251_v14  ;;  %v345_v22 = vadd.f32 %v337_v53, %v253_v5  ;;  %v444_v44 = vld [vmem:[%s1791_s3 + $0x2a8] sm:$0xff]  ;;  %v475_v46 = vld [vmem:[%s1791_s3 + $0x3a0] sm:$0xff]  ;;  %v478_v7 = vld [vmem:[%s1791_s3 + $0x3b8] sm:$0xff] }
  0x8c   :  { %v348_v26 = vadd.f32 %v340_v60, %v256_v17  ;;  %v350_v27 = vadd.f32 %v342_v62, %v258_v18  ;;  %v1141_v43 = vpack.c.bf16 %v474_v32, %v473_v31  ;;  %v1111_v53 = vpack.c.bf16 %v426_v38, %v425_v37  ;;  %v429_v10 = vld [vmem:[%s1791_s3 + $0x230] sm:$0xff]  ;;  %v430_v11 = vld [vmem:[%s1791_s3 + $0x238] sm:$0xff]  ;;  %v447_v15 = vld [vmem:[%s1791_s3 + $0x2c0] sm:$0xff] }
  0x8d   :  { %v352_v33 = vmax.f32 %v344_v19, 0.0  ;;  %v354_v34 = vmax.f32 %v346_v20, 0.0  ;;  %v351_v35 = vmax.f32 %v343_v21, 0.0  ;;  %v353_v36 = vmax.f32 %v345_v22, 0.0  ;;  %v461_v12 = vld [vmem:[%s1791_s3 + $0x330] sm:$0xff]  ;;  %v448_v16 = vld [vmem:[%s1791_s3 + $0x2c8] sm:$0xff] }
  0x8e   :  { %v356_v48 = vmax.f32 %v348_v26, 0.0  ;;  %v358_v51 = vmax.f32 %v350_v27, 0.0  ;;  %v1113_v60 = vpack.c.bf16 %v444_v44, %v443_v41  ;;  %v1145_v62 = vpack.c.bf16 %v476_v47, %v475_v46  ;;  %v479_v17 = vld [vmem:[%s1791_s3 + $0x3c0] sm:$0xff]  ;;  %v480_v18 = vld [vmem:[%s1791_s3 + $0x3c8] sm:$0xff]  ;;  %v449_v28 = vld [vmem:[%s1791_s3 + $0x2d0] sm:$0xff] }
  0x8f   :  { %558 = vmatprep.mubr.f32.mxu0 %v352_v33  ;;  %628 = vmatprep.mubr.f32.mxu1 %v354_v34  ;;  %v1115_v8 = vpack.c.bf16 %v428_v59, %v427_v57  ;;  %v1147_v9 = vpack.c.bf16 %v460_v3, %v459_v63  ;;  %v1117_v14 = vpack.c.bf16 %v446_v0, %v445_v6  ;;  %v431_v19 = vld [vmem:[%s1791_s3 + $0x240] sm:$0xff]  ;;  %v432_v20 = vld [vmem:[%s1791_s3 + $0x248] sm:$0xff]  ;;  %v450_v32 = vld [vmem:[%s1791_s3 + $0x2d8] sm:$0xff] }
  0x90   :  { %559 = vmatmul.mubr.f32.vlgmr.msra.gmra.mrb[0].mxu0 %v351_v35  ;;  %629 = vmatmul.mubr.f32.vlgmr.msra.gmra.mrb[0].mxu1 %v353_v36  ;;  %v1149_v5 = vpack.c.bf16 %v478_v7, %v477_v2  ;;  %v57_v21 = vrot.slane %v1480_v61, %v1460_v50  ;;  %v65_v22 = vrot.slane %v1490_v4, %v1460_v50  ;;  %v463_v26 = vld [vmem:[%s1791_s3 + $0x340] sm:$0xff]  ;;  %v464_v27 = vld [vmem:[%s1791_s3 + $0x348] sm:$0xff]  ;;  %v481_v33 = vld [vmem:[%s1791_s3 + $0x3d0] sm:$0xff] }
  0x91   :  { %1108 = vmatpush3.bf16.msra.mxu0 %v1107_v24  ;;  %1140 = vmatpush3.bf16.msra.mxu1 %v1139_v25  ;;  %v1119_v23 = vpack.c.bf16 %v430_v11, %v429_v10  ;;  %v1151_v24 = vpack.c.bf16 %v462_v13, %v461_v12  ;;  %v1121_v25 = vpack.c.bf16 %v448_v16, %v447_v15  ;;  %v482_v34 = vld [vmem:[%s1791_s3 + $0x3d8] sm:$0xff]  ;;  %v433_v39 = vld [vmem:[%s1791_s3 + $0x250] sm:$0xff]  ;;  %v435_v3 = vld [vmem:[%s1791_s3 + $0x260] sm:$0xff] }
  0x92   :  { %698 = vmatprep.mubr.f32.mxu0 %v356_v48  ;;  %768 = vmatprep.mubr.f32.mxu1 %v358_v51  ;;  %v1153_v31 = vpack.c.bf16 %v480_v18, %v479_v17  ;;  %v190_v35 = vrot.slane %v1480_v61, %v1463_v52  ;;  %v198_v36 = vrot.slane %v1490_v4, %v1463_v52  ;;  %v434_v40 = vld [vmem:[%s1791_s3 + $0x258] sm:$0xff]  ;;  %v465_v46 = vld [vmem:[%s1791_s3 + $0x350] sm:$0xff]  ;;  %v451_v48 = vld [vmem:[%s1791_s3 + $0x2e0] sm:$0xff] }
  0x93   :  { %1110 = vmatprep.subr.bf16.mxu0 %v1109_v42  ;;  %1142 = vmatprep.subr.bf16.mxu1 %v1141_v43  ;;  %v1123_v37 = vpack.c.bf16 %v432_v20, %v431_v19  ;;  %v1155_v38 = vpack.c.bf16 %v464_v27, %v463_v26  ;;  %v97_v41 = vrot.slane %v57_v21, %v1460_v50  ;;  %v466_v47 = vld [vmem:[%s1791_s3 + $0x358] sm:$0xff]  ;;  %v436_v6 = vld [vmem:[%s1791_s3 + $0x268] sm:$0xff]  ;;  %v467_v7 = vld [vmem:[%s1791_s3 + $0x360] sm:$0xff] }
  0x94   :  { %v105_v42 = vrot.slane %v65_v22, %v1460_v50  ;;  %v1125_v43 = vpack.c.bf16 %v450_v32, %v449_v28  ;;  %v1157_v44 = vpack.c.bf16 %v482_v34, %v481_v33  ;;  %v282_v51 = vrot.slane %v1480_v61, %v1473_v58  ;;  %v452_v50 = vld [vmem:[%s1791_s3 + $0x2e8] sm:$0xff]  ;;  %v486_v11 = vld [vmem:[%s1791_s3 + $0x3f8] sm:$0xff]  ;;  %v437_v20 = vld [vmem:[%s1791_s3 + $0x270] sm:$0xff] }
  0x95   :  { %1112 = vmatpush3.bf16.msra.mxu0 %v1111_v53  ;;  %1144 = vmatpush3.bf16.msra.mxu1 %v1143_v55  ;;  %v483_v53 = vld [vmem:[%s1791_s3 + $0x3e0] sm:$0xff]  ;;  %v484_v55 = vld [vmem:[%s1791_s3 + $0x3e8] sm:$0xff]  ;;  %v230_v57 = vrot.slane %v190_v35, %v1463_v52  ;;  %v238_v59 = vrot.slane %v198_v36, %v1463_v52  ;;  %v290_v61 = vrot.slane %v1490_v4, %v1473_v58  ;;  %v469_v22 = vld [vmem:[%s1791_s3 + $0x370] sm:$0xff] }
  0x96   :  { %1114 = vmatprep.subr.bf16.mxu0 %v1113_v60  ;;  %1146 = vmatprep.subr.bf16.mxu1 %v1145_v62  ;;  %v1127_v60 = vpack.c.bf16 %v434_v40, %v433_v39  ;;  %v138_v62 = vrot.slane %v1468_v54, %v1448_v45  ;;  %v1159_v63 = vpack.c.bf16 %v466_v47, %v465_v46 }
  0x97   :  { %v114_v0 = vmul.f32 %v97_v41, %v1524_v29  ;;  %v116_v52 = vmul.f32 %v105_v42, %v1524_v29  ;;  %v146_v4 = vrot.slane %v1468_v54, %v1458_v49  ;;  %v1129_v2 = vpack.c.bf16 %v452_v50, %v451_v48  ;;  %v454_v49 = vld [vmem:[%s1791_s3 + $0x2f8] sm:$0xff]  ;;  %v485_v54 = vld [vmem:[%s1791_s3 + $0x3f0] sm:$0xff] }
  0x98   :  { %v1161_v45 = vpack.c.bf16 %v484_v55, %v483_v53  ;;  %v322_v10 = vrot.slane %v282_v51, %v1473_v58  ;;  %v247_v12 = vmul.f32 %v230_v57, %v1547_v56  ;;  %v1131_v13 = vpack.c.bf16 %v436_v6, %v435_v3  ;;  %v786_v3 = vld [vmem:[%s1795_s5] sm:$0xff]  ;;  %v787_v6 = vld [vmem:[%s1795_s5 + $0x8] sm:$0xff] }
  0x99   :  { %1116 = vmatpush3.bf16.msra.mxu0 %v1115_v8  ;;  %1148 = vmatpush3.bf16.msra.mxu1 %v1147_v9  ;;  %v468_v8 = vld [vmem:[%s1791_s3 + $0x368] sm:$0xff]  ;;  %v453_v9 = vld [vmem:[%s1791_s3 + $0x2f0] sm:$0xff]  ;;  %v163_v16 = vadd.f32 %v138_v62, %v114_v0  ;;  %v165_v17 = vadd.f32 %v146_v4, %v116_v52  ;;  %v1165_v19 = vpack.c.bf16 %v486_v11, %v485_v54  ;;  %v1194_v52 = vmov 0.0|0.0  }
  0x9a   :  { %1118 = vmatprep.subr.bf16.mxu0 %v1117_v14  ;;  %1150 = vmatprep.subr.bf16.mxu1 %v1149_v5  ;;  %v249_v14 = vmul.f32 %v238_v59, %v1547_v56  ;;  %v330_v5 = vrot.slane %v290_v61, %v1473_v58  ;;  %v1163_v15 = vpack.c.bf16 %v468_v8, %v467_v7  ;;  %v438_v58 = vld [vmem:[%s1791_s3 + $0x278] sm:$0xff]  ;;  %v788_v4 = vld [vmem:[%s1795_s5 + $0x10] sm:$0xff]  ;;  %v1196_v7 = vmov 0.0  }
  0x9b   :  { %v1133_v18 = vpack.c.bf16 %v454_v49, %v453_v9  ;;  %v339_v21 = vmul.f32 %v322_v10, %v1526_v30  ;;  %v1135_v27 = vpack.c.bf16 %v438_v58, %v437_v20  ;;  %v1170_v0 = vpack.c.bf16 %v787_v6, %v786_v3 }
  0x9c   :  { %v341_v26 = vmul.f32 %v330_v5, %v1526_v30 }
  0x9d   :  { %1120 = vmatpush3.bf16.msra.mxu0 %v1119_v23  ;;  %1152 = vmatpush3.bf16.msra.mxu1 %v1151_v24  ;;  %v470_v23 = vld [vmem:[%s1791_s3 + $0x378] sm:$0xff]  ;;  %v255_v24 = vadd.f32 %v247_v12, %v163_v16 }
  0x9e   :  { %1122 = vmatprep.subr.bf16.mxu0 %v1121_v25  ;;  %1154 = vmatprep.subr.bf16.mxu1 %v1153_v31  ;;  %v257_v25 = vadd.f32 %v249_v14, %v165_v17  ;;  %v1167_v28 = vpack.c.bf16 %v470_v23, %v469_v22 }
  0x9f   :  { %v347_v31 = vadd.f32 %v339_v21, %v255_v24 }
  0xa0   :  { %v349_v32 = vadd.f32 %v341_v26, %v257_v25 }
  0xa1   :  { %1124 = vmatpush3.bf16.msra.mxu0 %v1123_v37  ;;  %1156 = vmatpush3.bf16.msra.mxu1 %v1155_v38  ;;  %v355_v33 = vmax.f32 %v347_v31, 0.0  ;;  %v883_v37 = vld [vmem:[%s1794_s4] ss:$0 sm:$0xff] }
  0xa2   :  { %1126 = vmatprep.subr.bf16.mxu0 %v1125_v43  ;;  %1158 = vmatprep.subr.bf16.mxu1 %v1157_v44  ;;  %v357_v34 = vmax.f32 %v349_v32, 0.0 }
  0xa5   :  { %1128 = vmatpush3.bf16.msra.mxu0 %v1127_v60  ;;  %1160 = vmatpush3.bf16.msra.mxu1 %v1159_v63 }
  0xa6   :  { %1130 = vmatprep.subr.bf16.mxu0 %v1129_v2  ;;  %1162 = vmatprep.subr.bf16.mxu1 %v1161_v45  ;;  %v789_v2 = vld [vmem:[%s1795_s5 + $0x18] sm:$0xff]  ;;  %s1198_s5 = smov 125  }
  0xa7   :  { %v1173_v45 = vpack.c.bf16 %v789_v2, %v788_v4 }
  0xa9   :  { %1132 = vmatpush3.bf16.msra.mxu0 %v1131_v13  ;;  %1164 = vmatpush3.bf16.msra.mxu1 %v1163_v15 }
  0xaa   :  { %1134 = vmatprep.subr.bf16.mxu0 %v1133_v18  ;;  %1166 = vmatprep.subr.bf16.mxu1 %v1165_v19 }
  0xad   :  { %1136 = vmatpush3.bf16.msra.mxu0 %v1135_v27  ;;  %1168 = vmatpush3.bf16.msra.mxu1 %v1167_v28 }
  0xae   :  { %1169 = vmatprep.subr.bf16.mxu0 %v1194_v52 }
  0xb0   :  { %699 = vmatmul.mubr.f32.vlgmr.msra.gmra.mrb[2].mxu0 %v355_v33  ;;  %769 = vmatmul.mubr.f32.vlgmr.msra.gmra.mrb[2].mxu1 %v357_v34 }
  0xb1   :  { %1171 = vmatpush3.bf16.msra.mxu0 %v1170_v0  ;;  %1038 = vmatprep.mubr.msk.f32.mxu0 %vm1195_vm1, %v1196_v7 }
  0xb2   :  { %1172 = vmatprep.subr.bf16.mxu0 %v1194_v52 }
  0xb5   :  { %1174 = vmatpush3.bf16.msra.mxu0 %v1173_v45 }
 0x163   :  { %v917_v35 = vpop.f32.mrb[0].mxu0  ;;  %v952_v36 = vpop.f32.mrb[0].mxu1 }
 0x164   :  { %v918_v38 = vpop.f32.mrb[1].mxu0  ;;  %v953_v39 = vpop.f32.mrb[1].mxu1 }
 0x165   :  { %v919_v40 = vadd.f32 %v918_v38, %v917_v35  ;;  %v954_v41 = vadd.f32 %v953_v39, %v952_v36 }
 0x167   :  { %v561_v42 = vadd.f32 %v919_v40, %v883_v37 }
 0x169   :  { %v631_v43 = vadd.f32 %v954_v41, %v561_v42 }
 0x183   :  { %v987_v44 = vpop.f32.mrb[2].mxu0  ;;  %v1022_v46 = vpop.f32.mrb[2].mxu1 }
 0x184   :  { %v988_v47 = vpop.f32.mrb[3].mxu0  ;;  %v1023_v48 = vpop.f32.mrb[3].mxu1 }
 0x185   :  { %v989_v51 = vadd.f32 %v988_v47, %v987_v44  ;;  %v1024_v50 = vadd.f32 %v1023_v48, %v1022_v46 }
 0x187   :  { %v701_v53 = vadd.f32 %v989_v51, %v631_v43 }
 0x189   :  { %v771_v55 = vadd.f32 %v1024_v50, %v701_v53 }
 0x18b   :  { %v775_v57 = vsel %vm774_vm0, %v771_v55, -inf }
 0x18c   :  { %776 = vmax.xlane.f32.xlu1 %v775_v57 }
 0x219   :  { %v777_v59 = vpop.xlane.xlu1 %776 }
 0x21a   :  { %v778_v61 = vsub.f32 %v771_v55, %v777_v59 }
 0x21c   :  { %v779_v60 = vmul.f32 1.442695, %v778_v61 }
 0x21e   :  { %1187 = vpow2.f32 %v779_v60 }
 0x228   :  { %v1188_v62 = vpop.eup %1187 }
 0x229   :  { %v781_v63 = vsel %vm774_vm0, %v1188_v62, 0.0 }
 0x22a   :  { %782 = vadd.xlane.f32.xlu0 %v781_v63 }
 0x2b7   :  { %v783_v8 = vpop.xlane.xlu0 %782 }
 0x2b8   :  { %1189 = vrcp.f32 %v783_v8 }
 0x2c2   :  { %v1190_v9 = vpop.eup %1189 }
 0x2c3   :  { %v785_v10 = vmul.f32 %v1190_v9, %v1188_v62 }
 0x2c5   :  { %1039 = vmatmul.mubr.msk.f32.vlgmr.msra.gmra.mrb[4].mxu0 %vm774_vm0, %v785_v10 }
 0x398   :  { %v859_v49 = vpop.f32.mrb[4].mxu0 }
 0x399   :  { %v865_v54 = vmul.f32 %v859_v49, %v1547_v56  ;;  %v871_v11 = vmul.f32 %v859_v49, %v1526_v30  ;;  %v1040_v12 = vpop.f32.mrb[5].mxu0  ;;  %v863_v14 = vmul.f32 %v859_v49, %v1524_v29 }
 0x39b   :  { %873 = vrot.lane.b32.xlu0 %v871_v11, %s1197_s12  ;;  %867 = vrot.lane.b32.xlu1 %v865_v54, %s1198_s5  ;;  %v864_v5 = vadd.f32 %v863_v14, %v1237_v1 }
 0x40d   :  { %v868_v13 = vpop.permute.xlu1 %867  ;;  %v874_v16 = vpop.permute.xlu0 %873 }
 0x40e   :  { %v870_v15 = vadd.f32 %v868_v13, %v864_v5 }
 0x410   :  { %v876_v17 = vadd.f32 %v874_v16, %v870_v15 }
 0x412   :  { %878 = vst.msk [vmem:[%s1796_s6] sm:$0xff] %vm877_vm2, %v876_v17 }

</bundles_post_ra>
